<compile_context>
chip_gen: v7x
topology: tpu7x:2x2x1
jax: 0.10.0
libtpu: 0.0.40
codegen_flags: <defaults>
</compile_context>

<pallas_src>
import jax
import jax.numpy as jnp
from jax.experimental import pallas as pl
from jax.experimental.pallas import tpu as pltpu

_SAMPLES_PER_ROW = 32  # 128 lanes / 4 input features


def mydictdense_kernel(w_ref, x_ref, o_ref):
    # w_ref : VMEM (128, 64) block-diagonal folded weight (32 copies of Wc).
    # x_ref : VMEM (TR, 128) input tile  -- 32 samples x 4 features per row.
    # o_ref : VMEM (TR, 64)  output tile -- 32 samples x 2 features per row.
    o_ref[...] = jnp.dot(
        x_ref[...],
        w_ref[...],
        preferred_element_type=jnp.float32,
        precision=jax.lax.Precision.HIGHEST,
    ).astype(o_ref.dtype)


def mydictdense_forward(x, w1, w2, w3, *, block_rows=4096, min_pallas_samples=65536):
    n, _ = x.shape
    hp = jax.lax.Precision.HIGHEST

    # Fold the weight chain once, outside the hot path: (4,4)@(4,4)@(4,2) -> (4,2).
    wc = jnp.dot(jnp.dot(w1, w2, precision=hp), w3, precision=hp)

    # Small / ragged batches: one fused XLA dot beats any kernel launch.
    if n % _SAMPLES_PER_ROW != 0 or n < max(int(min_pallas_samples), 256):
        return jnp.dot(x, wc, precision=hp)

    # Block-diagonal weight: 32 copies of Wc on the diagonal -> (128, 64).
    w_bd = jnp.kron(jnp.eye(_SAMPLES_PER_ROW, dtype=wc.dtype), wc)

    # Free contiguous reshape: batch lands on the 128-wide lane axis.
    rows = n // _SAMPLES_PER_ROW
    xr = x.reshape(rows, 128)

    # Row-tile: MiB-scale, multiple of 8 sublanes, and >= 2 grid steps when
    # possible so v7x's two TensorCores both get work.
    half = pl.cdiv(rows, 2)
    tr = max(8, min(block_rows, ((half + 7) // 8) * 8))
    grid = (pl.cdiv(rows, tr),)  # partial last block handled by Pallas

    out_r = pl.pallas_call(
        mydictdense_kernel,
        out_shape=jax.ShapeDtypeStruct((rows, 64), x.dtype),
        grid=grid,
        in_specs=[
            # Folded block-diagonal weight: tiny (32 KiB), same block every step.
            pl.BlockSpec((128, 64), lambda i: (0, 0)),
            # Input tile: (TR, 128), lane-dense, auto double-buffered.
            pl.BlockSpec((tr, 128), lambda i: (i, 0)),
        ],
        out_specs=pl.BlockSpec((tr, 64), lambda i: (i, 0)),
        compiler_params=pltpu.CompilerParams(
            dimension_semantics=("parallel",),  # shard batch tiles across TCs on v7x
        ),
    )(w_bd, xr)

    # Free contiguous reshape back to (N, 2) -- no slice, no transpose.
    return out_r.reshape(n, 2)


if __name__ == "__main__":
    key = jax.random.PRNGKey(0)
    kx1, kx2, k1, k2, k3 = jax.random.split(key, 5)

    # Deterministic parameters (module shapes: (4,4), (4,4), (4,2)).
    w1 = jax.random.normal(k1, (4, 4), dtype=jnp.float32)
    w2 = jax.random.normal(k2, (4, 4), dtype=jnp.float32)
    w3 = jax.random.normal(k3, (4, 2), dtype=jnp.float32)

    hp = jax.lax.Precision.HIGHEST

    def reference(xx):
        return jnp.dot(
            jnp.dot(jnp.dot(xx, w1, precision=hp), w2, precision=hp), w3, precision=hp
        )

    # 1) Small batch (N=8): dispatches to the fused XLA dot fast path.
    x_small = jax.random.normal(kx1, (8, 4), dtype=jnp.float32)
    out_small = jax.block_until_ready(mydictdense_forward(x_small, w1, w2, w3))
    assert out_small.shape == (8, 2)
    assert jnp.allclose(out_small, reference(x_small), atol=1e-4, rtol=1e-4)

    # 2) Moderate batch (N=4096): forces the Pallas MXU path (2 grid steps).
    x_big = jax.random.normal(kx2, (4096, 4), dtype=jnp.float32)
    out_big = jax.block_until_ready(
        mydictdense_forward(x_big, w1, w2, w3, min_pallas_samples=0)
    )
    assert out_big.shape == (4096, 2)
    assert jnp.allclose(out_big, reference(x_big), atol=1e-4, rtol=1e-4)

    print("KERNEL_OK")
</pallas_src>

<mosaic_0001>
module attributes {stable_mosaic.version = 11 : i64} {
  func.func @mydictdense_kernel(%arg0: i32, %arg1: memref<128x64xf32, #tpu.memory_space<vmem>>, %arg2: memref<64x128xf32, #tpu.memory_space<vmem>>, %arg3: memref<64x64xf32, #tpu.memory_space<vmem>>) attributes {dimension_semantics = [#tpu.dimension_semantics<parallel>], iteration_bounds = array<i64: 2>, scalar_prefetch = 0 : i64, scratch_operands = 0 : i64, tpu.core_type = #tpu.core_type<tc>, window_params = [{pipeline_mode = #tpu.pipeline_mode<synchronous>, transform_indices = @transform_0, window_bounds = array<i64: 128, 64>}, {transform_indices = @transform_1, window_bounds = array<i64: 64, 128>}, {transform_indices = @transform_2, window_bounds = array<i64: 64, 64>}]} {
    %c0 = arith.constant 0 : index
    %c0_0 = arith.constant 0 : index
    %0 = vector.load %arg2[%c0, %c0_0] : memref<64x128xf32, #tpu.memory_space<vmem>>, vector<64x128xf32>
    %c0_1 = arith.constant 0 : index
    %c0_2 = arith.constant 0 : index
    %1 = vector.load %arg1[%c0_1, %c0_2] : memref<128x64xf32, #tpu.memory_space<vmem>>, vector<128x64xf32>
    %cst = arith.constant dense<0.000000e+00> : vector<64x64xf32>
    %2 = tpu.matmul %0, %1, %cst {dimension_numbers = #tpu.dot_dimension_numbers<[1], [0], [0], [1], [0, 0, 1, 1], [], []>, precision = #tpu.contract_precision<fp32>} : vector<64x128xf32>, vector<128x64xf32>, vector<64x64xf32> -> vector<64x64xf32>
    %c0_3 = arith.constant 0 : index
    %c0_4 = arith.constant 0 : index
    %3 = vector.load %arg3[%c0_3, %c0_4] : memref<64x64xf32, #tpu.memory_space<vmem>>, vector<64x64xf32>
    tpu.vector_store %arg3[%c0_3, %c0_4], %2 {strides = array<i32>} : memref<64x64xf32, #tpu.memory_space<vmem>>, vector<64x64xf32>,
    return
  }
  func.func @transform_0(%arg0: i32) -> (i32, i32) {
    %c0_i32 = arith.constant 0 : i32
    %c0_i32_0 = arith.constant 0 : i32
    %c0_i32_1 = arith.constant 0 : i32
    return %c0_i32, %c0_i32_0 : i32, i32
  }
  func.func @transform_1(%arg0: i32) -> (i32, i32) {
    %c0_i32 = arith.constant 0 : i32
    %c0_i32_0 = arith.constant 0 : i32
    return %arg0, %c0_i32 : i32, i32
  }
  func.func @transform_2(%arg0: i32) -> (i32, i32) {
    %c0_i32 = arith.constant 0 : i32
    %c0_i32_0 = arith.constant 0 : i32
    return %arg0, %c0_i32 : i32, i32
  }
}

</mosaic_0001>

<bundles_post_ra>
// kernel: tpu_custom_call.1
= control target key start
LH: loop header
LB: loop body
LE: loop exit
PB: predicated region body
PF: predicated region fallthrough
CT: control target
= control target key end

     0   :  { %s1860_s9 = smov 0   ;;  %s2304_s0 = inlined_call_operand.vmem [shape: f32[128,64], index: 0, kind: input, shape index: {}]   ;;  %s2305_s1 = inlined_call_operand.vmem [shape: f32[128,128], index: 1, kind: input, shape index: {}]   ;;  %s2306_s2 = inlined_call_operand.vmem [shape: f32[128,64], index: 2, kind: output, shape index: {}]  }
   0x1 LB: > { %s1178_s10 = sadd.s32 4294967295, %s1843_s9   ;;  %p1182_p0 = scmp.ge.s32.totalorder %s1843_s9, 1  ;;  %s1843_s9 = sphi %s1860_s9, %s12_s9  }
   0x2   : > { %p113_p1 = scmp.lt.s32.totalorder %s1843_s9, 3 }
   0x4   : > { %p114_p2 = pnand %p1182_p0, %p113_p1 }
   0x6   : > { %117 = sbr.rel (%p114_p2) target bundleno = 342 (0x156), region = 28 }
   0xd   : > { %v155_v0 = vld [vmem:[%s2304_s0] sm:$0xff]  ;;  %v156_v1 = vld [vmem:[%s2304_s0 + $0x8] sm:$0xff]  ;;  %v157_v2 = vld [vmem:[%s2304_s0 + $0x10] sm:$0xff]  ;;  %s1183_s17 = sshll.u32 %s1178_s10, 3  ;;  %vm1113_vm0 = vcmask 523264  }
   0xe   : > { %v172_v3 = vand.u32 4294901760, %v155_v0  ;;  %v175_v4 = vand.u32 4294901760, %v156_v1  ;;  %v1880_v5 = vld [vmem:[%s2304_s0 + $0x18] sm:$0xff]  ;;  %v178_v6 = vand.u32 4294901760, %v157_v2  ;;  %v1885_v7 = vld [vmem:[%s2304_s0 + $0x20] sm:$0xff]  ;;  %v1890_v8 = vld [vmem:[%s2304_s0 + $0x28] sm:$0xff] }
   0xf   : > { %v181_v9 = vand.u32 4294901760, %v1880_v5  ;;  %v184_v11 = vand.u32 4294901760, %v1885_v7  ;;  %v187_v12 = vand.u32 4294901760, %v1890_v8  ;;  %v1902_v14 = vld [vmem:[%s2304_s0 + $0x30] sm:$0xff]  ;;  %v1907_v15 = vld [vmem:[%s2304_s0 + $0x38] sm:$0xff]  ;;  %p136_p3 = scmp.lt.s32.totalorder %s1183_s17, 15 }
  0x10   : > { %v1893_v10 = vpack.c.bf16 %v175_v4, %v172_v3  ;;  %v190_v17 = vand.u32 4294901760, %v1902_v14  ;;  %v193_v18 = vand.u32 4294901760, %v1907_v15  ;;  %v1928_v19 = vld [vmem:[%s2304_s0 + $0x40] sm:$0xff]  ;;  %v1933_v20 = vld [vmem:[%s2304_s0 + $0x48] sm:$0xff]  ;;  %v1959_v25 = vld [vmem:[%s2304_s0 + $0x50] sm:$0xff]  ;;  %v1971_v29 = vsub.f32 %v155_v0, %v172_v3 }
  0x11   : > { %v1897_v13 = vpack.c.bf16 %v181_v9, %v178_v6  ;;  %s2359_s17 = smov (!%p136_p3, %s1183_s17), 15  ;;  %v1921_v16 = vpack.c.bf16 %v187_v12, %v184_v11  ;;  %v196_v23 = vand.u32 4294901760, %v1928_v19  ;;  %v199_v24 = vand.u32 4294901760, %v1933_v20  ;;  %v1966_v27 = vld [vmem:[%s2304_s0 + $0x58] sm:$0xff]  ;;  %v1991_v35 = vld [vmem:[%s2304_s0 + $0x60] sm:$0xff]  ;;  %v1996_v36 = vld [vmem:[%s2304_s0 + $0x68] sm:$0xff] }
  0x12   : > { %1598 = vmatprep.subr.bf16.mxu1 %v1893_v10  ;;  %1694 = vmatprep.subr.bf16.mxu0 %v1893_v10  ;;  %s1184_s4 = sshll.u32 %s2359_s17, 3  ;;  %v1952_v22 = vpack.c.bf16 %v193_v18, %v190_v17  ;;  %v1973_v30 = vsub.f32 %v156_v1, %v175_v4  ;;  %v202_v32 = vand.u32 4294901760, %v1959_v25  ;;  %v2312_v34 = vand.u32 4294901760, %v1966_v27  ;;  %v2006_v40 = vld [vmem:[%s2304_s0 + $0x70] sm:$0xff]  ;;  %v2011_v41 = vld [vmem:[%s2304_s0 + $0x78] sm:$0xff] }
  0x13   : > { %1600 = vmatpush3.bf16.msra.mxu1 %v1893_v10  ;;  %1696 = vmatpush3.bf16.msra.mxu0 %v1893_v10  ;;  %s1941_s7 = scalar_lea.vmem %s2305_s1, %s1184_s4  ;;  %v1985_v33 = vpack.c.bf16 %v199_v24, %v196_v23  ;;  %v1999_v38 = vsub.f32 %v157_v2, %v178_v6  ;;  %v335_v43 = vand.u32 4294901760, %v1971_v29  ;;  %v2310_v46 = vand.u32 4294901760, %v1991_v35  ;;  %s2283_s24 = scalar_lea.vmem %s2306_s2, %s1184_s4 }
  0x14   : > { %1602 = vmatprep.subr.bf16.mxu1 %v1897_v13  ;;  %1698 = vmatprep.subr.bf16.mxu0 %v1897_v13  ;;  %v147_v21 = vld [vmem:[%s1941_s7] sm:$0xff]  ;;  %2331 = vst [vmem:[#allocation2_spill] sm:$0xff] %v1952_v22  ;;  %v148_v31 = vld [vmem:[%s1941_s7 + $0x8] sm:$0xff]  ;;  %v342_v44 = vand.u32 4294901760, %v1973_v30  ;;  %v149_v45 = vld [vmem:[%s1941_s7 + $0x10] sm:$0xff]  ;;  %v2309_v47 = vand.u32 4294901760, %v1996_v36  ;;  %v2022_v48 = vsub.f32 %v1880_v5, %v181_v9  ;;  %v2031_v50 = vpack.c.bf16 %v2312_v34, %v202_v32 }
  0x15   : > { %v1961_v26 = vand.u32 4294901760, %v147_v21  ;;  %2333 = vst [vmem:[#allocation4_spill] sm:$0xff] %v1985_v33  ;;  %v2001_v39 = vand.u32 4294901760, %v148_v31  ;;  %v150_v49 = vld [vmem:[%s1941_s7 + $0x18] sm:$0xff]  ;;  %v349_v52 = vand.u32 4294901760, %v1999_v38  ;;  %v2308_v53 = vand.u32 4294901760, %v2006_v40 }
  0x16   : > { %2334 = vst [vmem:[#allocation5_spill] sm:$0xff] %v2031_v50  ;;  %v2307_v54 = vand.u32 4294901760, %v2011_v41  ;;  %v2039_v56 = vand.u32 4294901760, %v149_v45  ;;  %v336_v57 = vsub.f32 %v1971_v29, %v335_v43  ;;  %v343_v58 = vsub.f32 %v1973_v30, %v342_v44  ;;  %v151_v60 = vld [vmem:[%s1941_s7 + $0x20] sm:$0xff] }
  0x17   : > { %1604 = vmatpush3.bf16.msra.mxu1 %v1897_v13  ;;  %1700 = vmatpush3.bf16.msra.mxu0 %v1897_v13  ;;  %v1969_v28 = vsub.f32 %v147_v21, %v1961_v26  ;;  %v2037_v55 = vsub.f32 %v148_v31, %v2001_v39  ;;  %v2043_v59 = vand.u32 4294901760, %v150_v49  ;;  %v2052_v61 = vpack.c.bf16 %v2309_v47, %v2310_v46  ;;  %v153_v31 = vld [vmem:[%s1941_s7 + $0x30] sm:$0xff] }
  0x18   : > { %1606 = vmatprep.subr.bf16.mxu1 %v1921_v16  ;;  %1702 = vmatprep.subr.bf16.mxu0 %v1921_v16  ;;  %v356_v62 = vand.u32 4294901760, %v2022_v48  ;;  %v2058_v63 = vsub.f32 %v1885_v7, %v184_v11  ;;  %v350_v0 = vsub.f32 %v1999_v38, %v349_v52  ;;  %v2066_v1 = vsub.f32 %v1890_v8, %v187_v12  ;;  %v152_v12 = vld [vmem:[%s1941_s7 + $0x28] sm:$0xff] }
  0x19   : > { %2332 = vst [vmem:[#allocation3_spill] sm:$0xff] %v1969_v28  ;;  %v254_v37 = vand.u32 4294901760, %v1969_v28  ;;  %2335 = vst [vmem:[#allocation6_spill] sm:$0xff] %v2052_v61  ;;  %v2071_v2 = vsub.f32 %v1902_v14, %v190_v17  ;;  %v2077_v3 = vpack.c.bf16 %v2307_v54, %v2308_v53  ;;  %v2311_v4 = vand.u32 4294901760, %v2037_v55 }
  0x1a   : > { %v2081_v5 = vsub.f32 %v149_v45, %v2039_v56  ;;  %v2083_v6 = vand.u32 4294901760, %v151_v60  ;;  %v337_v7 = vand.u32 4294901760, %v336_v57  ;;  %v344_v8 = vand.u32 4294901760, %v343_v58 }
  0x1b   : > { %1608 = vmatpush3.bf16.msra.mxu1 %v1921_v16  ;;  %1704 = vmatpush3.bf16.msra.mxu0 %v1921_v16  ;;  %v255_v42 = vsub.f32 %v1969_v28, %v254_v37  ;;  %2336 = vst [vmem:[#allocation7_spill] sm:$0xff] %v2077_v3  ;;  %v2088_v9 = vsub.f32 %v1907_v15, %v193_v18  ;;  %v351_v15 = vand.u32 4294901760, %v350_v0  ;;  %v363_v18 = vand.u32 4294901760, %v2058_v63 }
  0x1c   : > { %1610 = vmatprep.subr.bf16.mxu1 %v1952_v22  ;;  %1706 = vmatprep.subr.bf16.mxu0 %v1952_v22  ;;  %2337 = vst [vmem:[#allocation8_spill] sm:$0xff] %v2081_v5  ;;  %v2091_v11 = vsub.f32 %v150_v49, %v2043_v59  ;;  %v1725_v14 = vpack.c.bf16 %v342_v44, %v335_v43  ;;  %v274_v44 = vand.u32 4294901760, %v2081_v5  ;;  %v2112_v49 = vand.u32 4294901760, %v152_v12 }
  0x1d   : > { %1497 = vmatprep.mubr.f32.mxu0 %v254_v37  ;;  %v256_v51 = vand.u32 4294901760, %v255_v42  ;;  %v357_v17 = vsub.f32 %v2022_v48, %v356_v62  ;;  %v2097_v21 = vpack.c.bf16 %v356_v62, %v349_v52  ;;  %v370_v37 = vand.u32 4294901760, %v2066_v1 }
  0x1e   : > { %2338 = vst [vmem:[#allocation9_spill] sm:$0xff] %v2091_v11  ;;  %v2313_v42 = vand.u32 4294901760, %v2071_v2  ;;  %v265_v43 = vsub.f32 %v2037_v55, %v2311_v4  ;;  %v2110_v45 = vsub.f32 %v151_v60, %v2083_v6  ;;  %v1629_v52 = vpack.c.bf16 %v344_v8, %v337_v7 }
  0x1f   : > { %1612 = vmatpush3.bf16.msra.mxu1 %v1952_v22  ;;  %1708 = vmatpush3.bf16.msra.mxu0 %v1952_v22  ;;  %v384_v57 = vand.u32 4294901760, %v2088_v9  ;;  %v284_v58 = vand.u32 4294901760, %v2091_v11  ;;  %v2117_v62 = vand.u32 4294901760, %v153_v31  ;;  %v358_v0 = vand.u32 4294901760, %v357_v17 }
  0x20   : > { %1614 = vmatprep.subr.bf16.mxu1 %v1985_v33  ;;  %1710 = vmatprep.subr.bf16.mxu0 %v1985_v33  ;;  %v2124_v60 = vsub.f32 %v1928_v19, %v196_v23  ;;  %v2129_v7 = vsub.f32 %v1933_v20, %v199_v24  ;;  %v2132_v8 = vsub.f32 %v152_v12, %v2112_v49  ;;  %v266_v53 = vand.u32 4294901760, %v265_v43 }
  0x21   : > { %1365 = vmatprep.mubr.f32.mxu1 %v256_v51  ;;  %v154_v51 = vld [vmem:[%s1941_s7 + $0x38] sm:$0xff]  ;;  %2339 = vst [vmem:[#allocation10_spill] sm:$0xff] %v2117_v62  ;;  %v364_v54 = vsub.f32 %v2058_v63, %v363_v18  ;;  %v371_v17 = vsub.f32 %v2066_v1, %v370_v37  ;;  %v378_v19 = vsub.f32 %v2071_v2, %v2313_v42  ;;  %v294_v24 = vand.u32 4294901760, %v2110_v45 }
  0x22   : > { %v2141_v23 = vand.u32 4294901760, %v154_v51  ;;  %v275_v20 = vsub.f32 %v2081_v5, %v274_v44  ;;  %v2146_v12 = vsub.f32 %v153_v31, %v2117_v62  ;;  %v385_v47 = vsub.f32 %v2088_v9, %v384_v57 }
  0x23   : > { %1616 = vmatpush3.bf16.msra.mxu1 %v1985_v33  ;;  %1712 = vmatpush3.bf16.msra.mxu0 %v1985_v33  ;;  %v285_v46 = vsub.f32 %v2091_v11, %v284_v58  ;;  %v304_v4 = vand.u32 4294901760, %v2132_v8  ;;  %v391_v43 = vand.u32 4294901760, %v2124_v60  ;;  %v398_v42 = vand.u32 4294901760, %v2129_v7 }
  0x24   : > { %1618 = vmatprep.subr.bf16.mxu1 %v2031_v50  ;;  %1714 = vmatprep.subr.bf16.mxu0 %v2031_v50  ;;  %2340 = vst [vmem:[#allocation11_spill] sm:$0xff] %v2141_v23  ;;  %v2152_v34 = vsub.f32 %v154_v51, %v2141_v23  ;;  %v2161_v31 = vsub.f32 %v1959_v25, %v202_v32  ;;  %v2341_v11 = vand.u32 4294901760, %v1966_v27  ;;  %v379_v28 = vand.u32 4294901760, %v378_v19 }
  0x25   : > { %v1633_v51 = vpack.c.bf16 %v358_v0, %v351_v15  ;;  %v276_v33 = vand.u32 4294901760, %v275_v20  ;;  %v295_v23 = vsub.f32 %v2110_v45, %v294_v24  ;;  %v314_v62 = vand.u32 4294901760, %v2146_v12 }
  0x26   : > { %v2166_v5 = vsub.f32 %v1966_v27, %v2341_v11  ;;  %v2342_v25 = vand.u32 4294901760, %v2037_v55  ;;  %v386_v32 = vand.u32 4294901760, %v385_v47  ;;  %v286_v22 = vand.u32 4294901760, %v285_v46 }
  0x27   : > { %1620 = vmatpush3.bf16.msra.mxu1 %v2031_v50  ;;  %1716 = vmatpush3.bf16.msra.mxu0 %v2031_v50  ;;  %v372_v50 = vand.u32 4294901760, %v371_v17  ;;  %v305_v27 = vsub.f32 %v2132_v8, %v304_v4  ;;  %v324_v11 = vand.u32 4294901760, %v2152_v34  ;;  %v399_v15 = vsub.f32 %v2129_v7, %v398_v42 }
  0x28   : > { %1622 = vmatprep.subr.bf16.mxu1 %v2052_v61  ;;  %1718 = vmatprep.subr.bf16.mxu0 %v2052_v61  ;;  %v2343_v46 = vand.u32 4294901760, %v1991_v35  ;;  %v296_v0 = vand.u32 4294901760, %v295_v23  ;;  %v315_v17 = vsub.f32 %v2146_v12, %v314_v62  ;;  %v1641_v19 = vpack.c.bf16 %v386_v32, %v379_v28 }
  0x29   : > { %v2345_v20 = vand.u32 4294901760, %v2071_v2  ;;  %v2347_v23 = vand.u32 4294901760, %v2011_v41 }
  0x2a   : > { %v2182_v47 = vsub.f32 %v1991_v35, %v2343_v46  ;;  %v325_v35 = vsub.f32 %v2152_v34, %v324_v11 }
  0x2b   : > { %1624 = vmatpush3.bf16.msra.mxu1 %v2052_v61  ;;  %1720 = vmatpush3.bf16.msra.mxu0 %v2052_v61  ;;  %v365_v61 = vand.u32 4294901760, %v364_v54  ;;  %v392_v54 = vsub.f32 %v2124_v60, %v391_v43 }
  0x2c   : > { %1626 = vmatprep.subr.bf16.mxu1 %v2077_v3  ;;  %1722 = vmatprep.subr.bf16.mxu0 %v2077_v3  ;;  %v419_v28 = vand.u32 4294901760, %v2182_v47  ;;  %v326_v32 = vand.u32 4294901760, %v325_v35 }
  0x2f   : > { %1628 = vmatpush3.bf16.msra.mxu1 %v2077_v3  ;;  %1724 = vmatpush3.bf16.msra.mxu0 %v2077_v3  ;;  %v1733_v3 = vpack.c.bf16 %v370_v37, %v363_v18  ;;  %v405_v18 = vand.u32 4294901760, %v2161_v31  ;;  %v412_v37 = vand.u32 4294901760, %v2166_v5 }
  0x30   : > { %1630 = vmatprep.subr.bf16.mxu1 %v1629_v52  ;;  %1726 = vmatprep.subr.bf16.mxu0 %v1725_v14 }
  0x32   : > { %1366 = vmatmul.mubr.f32.vlgmr.msra.gmra.mrb[0].mxu1 %v266_v53  ;;  %1498 = vmatmul.mubr.f32.vlgmr.msra.gmra.mrb[0].mxu0 %v2342_v25  ;;  %v1637_v53 = vpack.c.bf16 %v372_v50, %v365_v61  ;;  %v1737_v25 = vpack.c.bf16 %v384_v57, %v2345_v20  ;;  %v306_v50 = vand.u32 4294901760, %v305_v27  ;;  %v393_v61 = vand.u32 4294901760, %v392_v54 }
  0x33   : > { %1632 = vmatpush3.bf16.msra.mxu1 %v1629_v52  ;;  %1728 = vmatpush3.bf16.msra.mxu0 %v1725_v14  ;;  %v2344_v52 = vand.u32 4294901760, %v1996_v36  ;;  %v1741_v54 = vpack.c.bf16 %v398_v42, %v391_v43  ;;  %v1661_v20 = vpack.c.bf16 %v1973_v30, %v1971_v29  ;;  %v1669_v29 = vpack.c.bf16 %v2066_v1, %v2058_v63  ;;  %v2348_v30 = vld [vmem:[#allocation2_spill] sm:$0xff]  ;;  %v2351_v63 = vld [vmem:[#allocation4_spill] sm:$0xff]  ;;  %v2352_v1 = vld [vmem:[#allocation3_spill] sm:$0xff] }
  0x34   : > { %1634 = vmatprep.subr.bf16.mxu1 %v1633_v51  ;;  %1730 = vmatprep.subr.bf16.mxu0 %v2097_v21 }
  0x35   : > { %v2187_v14 = vsub.f32 %v1996_v36, %v2344_v52  ;;  %1368 = vmatprep.mubr.f32.mxu1 %v276_v33  ;;  %1500 = vmatprep.mubr.f32.mxu0 %v274_v44  ;;  %v400_v36 = vand.u32 4294901760, %v399_v15  ;;  %v406_v33 = vsub.f32 %v2161_v31, %v405_v18  ;;  %v413_v44 = vsub.f32 %v2166_v5, %v412_v37 }
  0x36   : > { %1369 = vmatmul.mubr.f32.gmra.mrb[2].mxu1 %v286_v22  ;;  %1501 = vmatmul.mubr.f32.gmra.mrb[2].mxu0 %v284_v58  ;;  %v2346_v22 = vand.u32 4294901760, %v2006_v40 }
  0x37   : > { %1636 = vmatpush3.bf16.msra.mxu1 %v1633_v51  ;;  %1732 = vmatpush3.bf16.msra.mxu0 %v2097_v21  ;;  %v426_v57 = vand.u32 4294901760, %v2187_v14  ;;  %v2206_v21 = vsub.f32 %v2011_v41, %v2347_v23  ;;  %v316_v51 = vand.u32 4294901760, %v315_v17  ;;  %v1645_v27 = vpack.c.bf16 %v400_v36, %v393_v61 }
  0x38   : > { %1638 = vmatprep.subr.bf16.mxu1 %v1637_v53  ;;  %1734 = vmatprep.subr.bf16.mxu0 %v1733_v3  ;;  %v2201_v58 = vsub.f32 %v2006_v40, %v2346_v22  ;;  %v407_v15 = vand.u32 4294901760, %v406_v33  ;;  %v414_v46 = vand.u32 4294901760, %v413_v44  ;;  %v420_v40 = vsub.f32 %v2182_v47, %v419_v28 }
  0x39   : > { %1371 = vmatprep.mubr.f32.mxu1 %v296_v0  ;;  %1503 = vmatprep.mubr.f32.mxu0 %v294_v24  ;;  %v427_v52 = vsub.f32 %v2187_v14, %v426_v57  ;;  %v440_v24 = vand.u32 4294901760, %v2206_v21 }
  0x3a   : > { %1372 = vmatmul.mubr.f32.gmra.mrb[4].mxu1 %v306_v50  ;;  %1504 = vmatmul.mubr.f32.gmra.mrb[4].mxu0 %v304_v4  ;;  %v433_v41 = vand.u32 4294901760, %v2201_v58  ;;  %v1745_v4 = vpack.c.bf16 %v412_v37, %v405_v18  ;;  %v421_v42 = vand.u32 4294901760, %v420_v40 }
  0x3b   : > { %1640 = vmatpush3.bf16.msra.mxu1 %v1637_v53  ;;  %1736 = vmatpush3.bf16.msra.mxu0 %v1733_v3  ;;  %v1649_v3 = vpack.c.bf16 %v414_v46, %v407_v15  ;;  %v428_v43 = vand.u32 4294901760, %v427_v52  ;;  %v441_v0 = vsub.f32 %v2206_v21, %v440_v24 }
  0x3c   : > { %1642 = vmatprep.subr.bf16.mxu1 %v1641_v19  ;;  %1738 = vmatprep.subr.bf16.mxu0 %v1737_v25  ;;  %v434_v53 = vsub.f32 %v2201_v58, %v433_v41 }
  0x3d   : > { %1374 = vmatprep.mubr.f32.mxu1 %v316_v51  ;;  %1506 = vmatprep.mubr.f32.mxu0 %v314_v62  ;;  %v1653_v62 = vpack.c.bf16 %v428_v43, %v421_v42  ;;  %v442_v18 = vand.u32 4294901760, %v441_v0 }
  0x3e   : > { %1375 = vmatmul.mubr.f32.gmra.mrb[6].mxu1 %v326_v32  ;;  %1507 = vmatmul.mubr.f32.gmra.mrb[6].mxu0 %v324_v11  ;;  %v1749_v11 = vpack.c.bf16 %v426_v57, %v419_v28  ;;  %v435_v17 = vand.u32 4294901760, %v434_v53 }
  0x3f   : > { %1644 = vmatpush3.bf16.msra.mxu1 %v1641_v19  ;;  %1740 = vmatpush3.bf16.msra.mxu0 %v1737_v25  ;;  %v1753_v19 = vpack.c.bf16 %v440_v24, %v433_v41  ;;  %v1665_v25 = vpack.c.bf16 %v2022_v48, %v1999_v38  ;;  %v2349_v38 = vld [vmem:[#allocation10_spill] sm:$0xff]  ;;  %v2350_v48 = vld [vmem:[#allocation11_spill] sm:$0xff] }
  0x40   : > { %1646 = vmatprep.subr.bf16.mxu1 %v1645_v27  ;;  %1742 = vmatprep.subr.bf16.mxu0 %v1741_v54  ;;  %v1657_v37 = vpack.c.bf16 %v442_v18, %v435_v17 }
  0x41   : > { %1409 = vmatprep.mubr.f32.mxu1 %v1961_v26  ;;  %1541 = vmatprep.mubr.f32.mxu0 %v1961_v26 }
  0x43   : > { %1648 = vmatpush3.bf16.msra.mxu1 %v1645_v27  ;;  %1744 = vmatpush3.bf16.msra.mxu0 %v1741_v54 }
  0x44   : > { %1650 = vmatprep.subr.bf16.mxu1 %v1649_v3  ;;  %1746 = vmatprep.subr.bf16.mxu0 %v1745_v4 }
  0x47   : > { %1652 = vmatpush3.bf16.msra.mxu1 %v1649_v3  ;;  %1748 = vmatpush3.bf16.msra.mxu0 %v1745_v4 }
  0x48   : > { %1654 = vmatprep.subr.bf16.mxu1 %v1653_v62  ;;  %1750 = vmatprep.subr.bf16.mxu0 %v1749_v11 }
  0x4b   : > { %1656 = vmatpush3.bf16.msra.mxu1 %v1653_v62  ;;  %1752 = vmatpush3.bf16.msra.mxu0 %v1749_v11 }
  0x4c   : > { %1658 = vmatprep.subr.bf16.mxu1 %v1657_v37  ;;  %1754 = vmatprep.subr.bf16.mxu0 %v1753_v19 }
  0x4f   : > { %1660 = vmatpush3.bf16.msra.mxu1 %v1657_v37  ;;  %1756 = vmatpush3.bf16.msra.mxu0 %v1753_v19 }
  0x50   : > { %1662 = vmatprep.subr.bf16.mxu1 %v1661_v20  ;;  %1758 = vmatprep.subr.bf16.mxu0 %v1893_v10 }
  0x52   : > { %1410 = vmatmul.mubr.f32.vlgmr.msra.gmra.mrb[0].mxu1 %v2001_v39  ;;  %1542 = vmatmul.mubr.f32.vlgmr.msra.gmra.mrb[0].mxu0 %v2001_v39 }
  0x53   : > { %1664 = vmatpush3.bf16.msra.mxu1 %v1661_v20  ;;  %1760 = vmatpush3.bf16.msra.mxu0 %v1893_v10  ;;  %v1673_v10 = vpack.c.bf16 %v2088_v9, %v2071_v2  ;;  %v2353_v2 = vld [vmem:[#allocation5_spill] sm:$0xff]  ;;  %v1685_v9 = vpack.c.bf16 %v2187_v14, %v2182_v47 }
  0x54   : > { %1666 = vmatprep.subr.bf16.mxu1 %v1665_v25  ;;  %1762 = vmatprep.subr.bf16.mxu0 %v1897_v13 }
  0x55   : > { %1412 = vmatprep.mubr.f32.mxu1 %v2039_v56  ;;  %1544 = vmatprep.mubr.f32.mxu0 %v2039_v56 }
  0x56   : > { %1413 = vmatmul.mubr.f32.gmra.mrb[2].mxu1 %v2043_v59  ;;  %1545 = vmatmul.mubr.f32.gmra.mrb[2].mxu0 %v2043_v59 }
  0x57   : > { %1668 = vmatpush3.bf16.msra.mxu1 %v1665_v25  ;;  %1764 = vmatpush3.bf16.msra.mxu0 %v1897_v13  ;;  %v1677_v13 = vpack.c.bf16 %v2129_v7, %v2124_v60  ;;  %v2354_v60 = vld [vmem:[#allocation6_spill] sm:$0xff]  ;;  %v2356_v7 = vld [vmem:[#allocation8_spill] sm:$0xff] }
  0x58   : > { %1670 = vmatprep.subr.bf16.mxu1 %v1669_v29  ;;  %1766 = vmatprep.subr.bf16.mxu0 %v1921_v16 }
  0x59   : > { %1415 = vmatprep.mubr.f32.mxu1 %v2083_v6  ;;  %1547 = vmatprep.mubr.f32.mxu0 %v2083_v6 }
  0x5a   : > { %1416 = vmatmul.mubr.f32.gmra.mrb[4].mxu1 %v2112_v49  ;;  %1548 = vmatmul.mubr.f32.gmra.mrb[4].mxu0 %v2112_v49 }
  0x5b   : > { %1672 = vmatpush3.bf16.msra.mxu1 %v1669_v29  ;;  %1768 = vmatpush3.bf16.msra.mxu0 %v1921_v16  ;;  %v1681_v16 = vpack.c.bf16 %v2166_v5, %v2161_v31  ;;  %v1689_v5 = vpack.c.bf16 %v2206_v21, %v2201_v58  ;;  %v2357_v31 = vld [vmem:[#allocation9_spill] sm:$0xff] }
  0x5c   : > { %1674 = vmatprep.subr.bf16.mxu1 %v1673_v10  ;;  %1770 = vmatprep.subr.bf16.mxu0 %v2348_v30 }
  0x5d   : > { %1418 = vmatprep.mubr.f32.mxu1 %v2349_v38  ;;  %1550 = vmatprep.mubr.f32.mxu0 %v2349_v38 }
  0x5e   : > { %1419 = vmatmul.mubr.f32.gmra.mrb[6].mxu1 %v2350_v48  ;;  %1551 = vmatmul.mubr.f32.gmra.mrb[6].mxu0 %v2350_v48 }
  0x5f   : > { %1676 = vmatpush3.bf16.msra.mxu1 %v1673_v10  ;;  %1772 = vmatpush3.bf16.msra.mxu0 %v2348_v30 }
  0x60   : > { %1678 = vmatprep.subr.bf16.mxu1 %v1677_v13  ;;  %1774 = vmatprep.subr.bf16.mxu0 %v2351_v63 }
  0x61   : > { %1453 = vmatprep.mubr.f32.mxu1 %v2352_v1  ;;  %1585 = vmatprep.mubr.f32.mxu0 %v1961_v26  ;;  %v2355_v26 = vld [vmem:[#allocation7_spill] sm:$0xff] }
  0x63   : > { %1680 = vmatpush3.bf16.msra.mxu1 %v1677_v13  ;;  %1776 = vmatpush3.bf16.msra.mxu0 %v2351_v63 }
  0x64   : > { %1682 = vmatprep.subr.bf16.mxu1 %v1681_v16  ;;  %1778 = vmatprep.subr.bf16.mxu0 %v2353_v2 }
  0x67   : > { %1684 = vmatpush3.bf16.msra.mxu1 %v1681_v16  ;;  %1780 = vmatpush3.bf16.msra.mxu0 %v2353_v2 }
  0x68   : > { %1686 = vmatprep.subr.bf16.mxu1 %v1685_v9  ;;  %1782 = vmatprep.subr.bf16.mxu0 %v2354_v60 }
  0x6b   : > { %1688 = vmatpush3.bf16.msra.mxu1 %v1685_v9  ;;  %1784 = vmatpush3.bf16.msra.mxu0 %v2354_v60 }
  0x6c   : > { %1690 = vmatprep.subr.bf16.mxu1 %v1689_v5  ;;  %1786 = vmatprep.subr.bf16.mxu0 %v2355_v26 }
  0x6f   : > { %1692 = vmatpush3.bf16.msra.mxu1 %v1689_v5  ;;  %1788 = vmatpush3.bf16.msra.mxu0 %v2355_v26 }
  0x72   : > { %1454 = vmatmul.mubr.f32.vlgmr.msra.gmra.mrb[0].mxu1 %v2037_v55  ;;  %1586 = vmatmul.mubr.f32.vlgmr.msra.gmra.mrb[0].mxu0 %v2001_v39 }
  0x73   : > { %1456 = vmatprep.mubr.f32.mxu1 %v2356_v7  ;;  %1588 = vmatprep.mubr.f32.mxu0 %v2039_v56 }
  0x76   : > { %1457 = vmatmul.mubr.f32.gmra.mrb[2].mxu1 %v2357_v31  ;;  %1589 = vmatmul.mubr.f32.gmra.mrb[2].mxu0 %v2043_v59 }
  0x77   : > { %1459 = vmatprep.mubr.f32.mxu1 %v2110_v45  ;;  %1591 = vmatprep.mubr.f32.mxu0 %v2083_v6 }
  0x7a   : > { %1460 = vmatmul.mubr.f32.gmra.mrb[4].mxu1 %v2132_v8  ;;  %1592 = vmatmul.mubr.f32.gmra.mrb[4].mxu0 %v2112_v49 }
  0x7b   : > { %1462 = vmatprep.mubr.f32.mxu1 %v2146_v12  ;;  %1594 = vmatprep.mubr.f32.mxu0 %v2349_v38 }
  0x7e   : > { %1463 = vmatmul.mubr.f32.gmra.mrb[6].mxu1 %v2152_v34  ;;  %1595 = vmatmul.mubr.f32.gmra.mrb[6].mxu0 %v2350_v48 }
 0x145   : > { %v1455_v39 = vpop.f32.mrb[0].mxu1  ;;  %v1587_v55 = vpop.f32.mrb[0].mxu0 }
 0x146   : > { %v1789_v56 = vadd.f32 %v1587_v55, %v1455_v39  ;;  %v625_v59 = vpop.f32.mrb[1].mxu1  ;;  %v1067_v6 = vpop.f32.mrb[1].mxu0 }
 0x147   : > { %v1790_v45 = vadd.f32 %v1067_v6, %v625_v59 }
 0x148   : > { %1115 = vst.msk [vmem:[%s2283_s24 + $0x8] sm:$0xff] %vm1113_vm0, %v1789_v56 }
 0x149   : > { %1114 = vst.msk [vmem:[%s2283_s24] sm:$0xff] %vm1113_vm0, %v1790_v45  ;;  %v1458_v34 = vpop.f32.mrb[2].mxu1  ;;  %v1590_v49 = vpop.f32.mrb[2].mxu0 }
 0x14a   : > { %v1791_v8 = vadd.f32 %v1590_v49, %v1458_v34  ;;  %v639_v12 = vpop.f32.mrb[3].mxu1  ;;  %v1079_v47 = vpop.f32.mrb[3].mxu0 }
 0x14b   : > { %v1792_v14 = vadd.f32 %v1079_v47, %v639_v12 }
 0x14c   : > { %1117 = vst.msk [vmem:[%s2283_s24 + $0x18] sm:$0xff] %vm1113_vm0, %v1791_v8 }
 0x14d   : > { %1116 = vst.msk [vmem:[%s2283_s24 + $0x10] sm:$0xff] %vm1113_vm0, %v1792_v14  ;;  %v1461_v50 = vpop.f32.mrb[4].mxu1  ;;  %v1593_v35 = vpop.f32.mrb[4].mxu0 }
 0x14e   : > { %v1793_v61 = vadd.f32 %v1593_v35, %v1461_v50  ;;  %v653_v36 = vpop.f32.mrb[5].mxu1  ;;  %v1091_v33 = vpop.f32.mrb[5].mxu0 }
 0x14f   : > { %v1794_v44 = vadd.f32 %v1091_v33, %v653_v36 }
 0x150   : > { %1119 = vst.msk [vmem:[%s2283_s24 + $0x28] sm:$0xff] %vm1113_vm0, %v1793_v61 }
 0x151   : > { %1118 = vst.msk [vmem:[%s2283_s24 + $0x20] sm:$0xff] %vm1113_vm0, %v1794_v44  ;;  %v1464_v28 = vpop.f32.mrb[6].mxu1  ;;  %v1596_v57 = vpop.f32.mrb[6].mxu0 }
 0x152   : > { %v1795_v22 = vadd.f32 %v1596_v57, %v1464_v28  ;;  %v667_v58 = vpop.f32.mrb[7].mxu1  ;;  %v1103_v23 = vpop.f32.mrb[7].mxu0 }
 0x153   : > { %v1796_v21 = vadd.f32 %v1103_v23, %v667_v58 }
 0x154   : > { %1121 = vst.msk [vmem:[%s2283_s24 + $0x38] sm:$0xff] %vm1113_vm0, %v1795_v22 }
 0x155   : > { %1120 = vst.msk [vmem:[%s2283_s24 + $0x30] sm:$0xff] %vm1113_vm0, %v1796_v21 }
 0x156 PF: > { %s12_s9 = sadd.s32 1, %s1843_s9  }
 0x157   : > { %p9_p4 = scmp.ge.s32.totalorder %s12_s9, 4  }
 0x159   :  { %11 = sbr.rel (!%p9_p4) target bundleno = 1 (0x1), region = 58 }

</bundles_post_ra>
